<compile_context>
chip_gen: v6e
topology: v6e:2x2x1
jax: 0.10.0
libtpu: 0.0.40
codegen_flags: <defaults>
</compile_context>

<pallas_src>
import functools

import jax
import jax.numpy as jnp
from jax.experimental import pallas as pl
from jax.experimental.pallas import tpu as pltpu


# ---------------------------------------------------------------- LayerNorm kernel
def _layernorm_kernel(x_ref, a_ref, b_ref, o_ref, *, eps):
    x = x_ref[...].astype(jnp.float32)                       # (TN, D)
    d = x.shape[-1]
    mean = jnp.mean(x, axis=-1, keepdims=True)
    diff = x - mean
    # torch.std default is unbiased (divisor D-1)
    var = jnp.sum(diff * diff, axis=-1, keepdims=True) * (1.0 / (d - 1))
    inv = 1.0 / (jnp.sqrt(var) + eps)                         # per-row (TN,1): cheap
    a = a_ref[...].astype(jnp.float32)                        # (1, D), stays resident
    b = b_ref[...].astype(jnp.float32)
    o_ref[...] = (a * (diff * inv) + b).astype(o_ref.dtype)


# ------------------------------------------------- residual + (inverted) dropout kernel
def _residual_dropout_kernel(x_ref, y_ref, o_ref, *, p, seed, tile_rows):
    x = x_ref[...].astype(jnp.float32)
    y = y_ref[...].astype(jnp.float32)
    if p >= 1.0:
        y = jnp.zeros_like(y)
    elif p > 0.0:
        shape = x_ref.shape                                   # (TN, C)
        # Unique per-element counter: global element index within the flat slab.
        row = jax.lax.broadcasted_iota(jnp.int32, shape, 0)
        col = jax.lax.broadcasted_iota(jnp.int32, shape, 1)
        gid = pl.program_id(0)
        lin = (gid * tile_rows + row) * shape[1] + col
        # 32-bit mixer (murmur3-style finalizer) keyed by the seed.
        seed_mix = jnp.uint32((int(seed) * 0x9E3779B9) & 0xFFFFFFFF)
        h = lin.astype(jnp.uint32) + seed_mix
        h = h ^ (h >> 16)
        h = h * jnp.uint32(0x7FEB352D)
        h = h ^ (h >> 15)
        h = h * jnp.uint32(0x846CA68B)
        h = h ^ (h >> 16)
        # Integer-threshold keep test: keep w.p. ~ (1 - p).
        thr = jnp.uint32(min(int(round(p * (1 << 32))), (1 << 32) - 1))
        keep = h >= thr
        y = jnp.where(keep, y * jnp.float32(1.0 / (1.0 - p)), jnp.float32(0.0))
    o_ref[...] = (x + y).astype(o_ref.dtype)


# ---------------------------------------------------------------- tiling helpers
def _pick_tile_rows(n_rows, n_cols, itemsize, n_bufs, budget_bytes=24 << 20):
    """Largest row tile whose double-buffered working set fits a conservative VMEM budget."""
    t = budget_bytes // max(1, n_bufs * n_cols * itemsize)
    t = int(min(n_rows, max(8, t)))
    if t < n_rows:
        t = max(8, (t // 8) * 8)      # keep sublane alignment when actually tiling
    return t


def _layernorm_call(x2, a2r, b2r, eps):
    N, D = x2.shape
    tn = _pick_tile_rows(N, D, x2.dtype.itemsize, n_bufs=4)   # in + out, double-buffered
    return pl.pallas_call(
        functools.partial(_layernorm_kernel, eps=eps),
        out_shape=jax.ShapeDtypeStruct((N, D), x2.dtype),
        grid=(pl.cdiv(N, tn),),
        in_specs=[
            pl.BlockSpec((tn, D), lambda i: (i, 0)),
            pl.BlockSpec((1, D), lambda i: (0, 0)),
            pl.BlockSpec((1, D), lambda i: (0, 0)),
        ],
        out_specs=pl.BlockSpec((tn, D), lambda i: (i, 0)),
        compiler_params=pltpu.CompilerParams(dimension_semantics=("parallel",)),
    )(x2, a2r, b2r)


def _residual_dropout_call(xs, ys, p, seed):
    M, C = xs.shape
    tm = _pick_tile_rows(M, C, xs.dtype.itemsize, n_bufs=6)   # 2 in + 1 out, double-buffered
    return pl.pallas_call(
        functools.partial(_residual_dropout_kernel, p=p, seed=seed, tile_rows=tm),
        out_shape=jax.ShapeDtypeStruct((M, C), xs.dtype),
        grid=(pl.cdiv(M, tm),),
        in_specs=[
            pl.BlockSpec((tm, C), lambda i: (i, 0)),
            pl.BlockSpec((tm, C), lambda i: (i, 0)),
        ],
        out_specs=pl.BlockSpec((tm, C), lambda i: (i, 0)),
        input_output_aliases={1: 0},   # y is dead after the add; reuse its buffer
        compiler_params=pltpu.CompilerParams(dimension_semantics=("parallel",)),
    )(xs, ys)


# ---------------------------------------------------------------- python wrapper
def sublayer_connection(x, a2, b2, sublayer, *, dropout_p=0.1, eps=1e-6,
                        seed=0, training=True):
    """x: (B, S, D); sublayer: arbitrary JAX callable applied to the normed input."""
    B, S, D = x.shape
    N = B * S
    x2 = x.reshape(N, D)
    a2r = a2.reshape(1, D).astype(x.dtype)
    b2r = b2.reshape(1, D).astype(x.dtype)

    # --- LayerNorm (row-wise reduction + elementwise) ---
    normed = _layernorm_call(x2, a2r, b2r, eps)

    # --- arbitrary sublayer (plain JAX glue, as in the PyTorch module) ---
    y2 = sublayer(normed.reshape(B, S, D)).reshape(N, D).astype(x.dtype)

    # --- residual add + inverted dropout (pure elementwise) ---
    p = float(dropout_p) if training else 0.0
    if D % 128 != 0 and (N * D) % 128 == 0:
        # Lane-dense view for the elementwise kernel: avoids masked partial stores.
        M = (N * D) // 128
        out = _residual_dropout_call(x2.reshape(M, 128), y2.reshape(M, 128),
                                     p, seed).reshape(N, D)
    else:
        out = _residual_dropout_call(x2, y2, p, seed)

    return out.reshape(B, S, D)


if __name__ == "__main__":
    B, S, D = 2, 8, 32  # batch, seq, embedding size

    key = jax.random.PRNGKey(0)
    kx, kw = jax.random.split(key)
    x = jax.random.normal(kx, (B, S, D), dtype=jnp.float32)

    # LayerNorm parameters (matches nn.Parameter(ones/zeros))
    a2 = jnp.ones((D,), dtype=jnp.float32)
    b2 = jnp.zeros((D,), dtype=jnp.float32)

    # Example sublayer: small deterministic linear map (stand-in for attention/FFN)
    w = jax.random.normal(kw, (D, D), dtype=jnp.float32) * 0.02
    sublayer = lambda z: z @ w

    # Eval mode (dropout off): compare against a pure-JAX reference.
    out_eval = sublayer_connection(x, a2, b2, sublayer,
                                   dropout_p=0.1, eps=1e-6, training=False)
    mean = x.mean(-1, keepdims=True)
    diff = x - mean
    std = jnp.sqrt((diff * diff).sum(-1, keepdims=True) / (D - 1))
    ref = x + (a2 * diff / (std + 1e-6) + b2) @ w
    assert out_eval.shape == (B, S, D) and out_eval.dtype == x.dtype
    assert jnp.allclose(out_eval, ref, atol=1e-4, rtol=1e-4), "eval-mode mismatch"

    # Training mode (dropout on): exercise the masked path.
    out_train = sublayer_connection(x, a2, b2, sublayer,
                                    dropout_p=0.1, eps=1e-6, seed=0, training=True)
    jax.block_until_ready(out_train)
    assert out_train.shape == (B, S, D) and out_train.dtype == x.dtype
    print("KERNEL_OK")
</pallas_src>

<mosaic_0001>
module attributes {stable_mosaic.version = 11 : i64} {
  func.func @_layernorm_kernel(%arg0: i32, %arg1: memref<16x32xf32, #tpu.memory_space<vmem>>, %arg2: memref<1x32xf32, #tpu.memory_space<vmem>>, %arg3: memref<1x32xf32, #tpu.memory_space<vmem>>, %arg4: memref<16x32xf32, #tpu.memory_space<vmem>>) attributes {dimension_semantics = [#tpu.dimension_semantics<parallel>], iteration_bounds = array<i64: 1>, scalar_prefetch = 0 : i64, scratch_operands = 0 : i64, tpu.core_type = #tpu.core_type<tc>, window_params = [{transform_indices = @transform_0, window_bounds = array<i64: 16, 32>}, {pipeline_mode = #tpu.pipeline_mode<synchronous>, transform_indices = @transform_1, window_bounds = array<i64: 1, 32>}, {pipeline_mode = #tpu.pipeline_mode<synchronous>, transform_indices = @transform_2, window_bounds = array<i64: 1, 32>}, {transform_indices = @transform_3, window_bounds = array<i64: 16, 32>}]} {
    %c0 = arith.constant 0 : index
    %c0_0 = arith.constant 0 : index
    %0 = vector.load %arg1[%c0, %c0_0] : memref<16x32xf32, #tpu.memory_space<vmem>>, vector<16x32xf32>
    %cst = arith.constant dense<0.000000e+00> : vector<16xf32>
    %1 = vector.multi_reduction <add>, %0, %cst [1] : vector<16x32xf32> to vector<16xf32>
    %2 = vector.shape_cast %1 : vector<16xf32> to vector<16x1xf32>
    %cst_1 = arith.constant 3.200000e+01 : f32
    %3 = vector.broadcast %cst_1 : f32 to vector<16x1xf32>
    %4 = arith.divf %2, %3 : vector<16x1xf32>
    %5 = vector.broadcast %4 : vector<16x1xf32> to vector<16x32xf32>
    %6 = arith.subf %0, %5 : vector<16x32xf32>
    %7 = arith.mulf %6, %6 : vector<16x32xf32>
    %cst_2 = arith.constant dense<0.000000e+00> : vector<16xf32>
    %8 = vector.multi_reduction <add>, %7, %cst_2 [1] : vector<16x32xf32> to vector<16xf32>
    %9 = vector.shape_cast %8 : vector<16xf32> to vector<16x1xf32>
    %cst_3 = arith.constant 0.0322580636 : f32
    %10 = vector.broadcast %cst_3 : f32 to vector<16x1xf32>
    %11 = arith.mulf %9, %10 : vector<16x1xf32>
    %12 = math.sqrt %11 : vector<16x1xf32>
    %cst_4 = arith.constant 9.99999997E-7 : f32
    %13 = vector.broadcast %cst_4 : f32 to vector<16x1xf32>
    %14 = arith.addf %12, %13 : vector<16x1xf32>
    %cst_5 = arith.constant 1.000000e+00 : f32
    %15 = vector.broadcast %cst_5 : f32 to vector<16x1xf32>
    %16 = arith.divf %15, %14 : vector<16x1xf32>
    %c0_6 = arith.constant 0 : index
    %c0_7 = arith.constant 0 : index
    %17 = vector.load %arg2[%c0_6, %c0_7] : memref<1x32xf32, #tpu.memory_space<vmem>>, vector<1x32xf32>
    %c0_8 = arith.constant 0 : index
    %c0_9 = arith.constant 0 : index
    %18 = vector.load %arg3[%c0_8, %c0_9] : memref<1x32xf32, #tpu.memory_space<vmem>>, vector<1x32xf32>
    %19 = vector.broadcast %16 : vector<16x1xf32> to vector<16x32xf32>
    %20 = arith.mulf %6, %19 : vector<16x32xf32>
    %21 = vector.broadcast %17 : vector<1x32xf32> to vector<16x32xf32>
    %22 = arith.mulf %21, %20 : vector<16x32xf32>
    %23 = vector.broadcast %18 : vector<1x32xf32> to vector<16x32xf32>
    %24 = arith.addf %22, %23 : vector<16x32xf32>
    %c0_10 = arith.constant 0 : index
    %c0_11 = arith.constant 0 : index
    %25 = vector.load %arg4[%c0_10, %c0_11] : memref<16x32xf32, #tpu.memory_space<vmem>>, vector<16x32xf32>
    tpu.vector_store %arg4[%c0_10, %c0_11], %24 {strides = array<i32>} : memref<16x32xf32, #tpu.memory_space<vmem>>, vector<16x32xf32>,
    return
  }
  func.func @transform_0(%arg0: i32) -> (i32, i32) {
    %c0_i32 = arith.constant 0 : i32
    %c0_i32_0 = arith.constant 0 : i32
    return %arg0, %c0_i32 : i32, i32
  }
  func.func @transform_1(%arg0: i32) -> (i32, i32) {
    %c0_i32 = arith.constant 0 : i32
    %c0_i32_0 = arith.constant 0 : i32
    %c0_i32_1 = arith.constant 0 : i32
    return %c0_i32, %c0_i32_0 : i32, i32
  }
  func.func @transform_2(%arg0: i32) -> (i32, i32) {
    %c0_i32 = arith.constant 0 : i32
    %c0_i32_0 = arith.constant 0 : i32
    %c0_i32_1 = arith.constant 0 : i32
    return %c0_i32, %c0_i32_0 : i32, i32
  }
  func.func @transform_3(%arg0: i32) -> (i32, i32) {
    %c0_i32 = arith.constant 0 : i32
    %c0_i32_0 = arith.constant 0 : i32
    return %arg0, %c0_i32 : i32, i32
  }
}

</mosaic_0001>

<bundles_post_ra>
// kernel: tpu_custom_call.1
= control target key start
LH: loop header
LB: loop body
LE: loop exit
PB: predicated region body
PF: predicated region fallthrough
CT: control target
= control target key end

     0   :  { %8 = vsyncpa [#allocation3], 0  ;;  %s218_s0 = inlined_call_operand.hbm [shape: f32[16,32], index: 0, kind: input, shape index: {}]   ;;  %s219_s1 = inlined_call_operand.vmem [shape: f32[1,32], index: 1, kind: input, shape index: {}]   ;;  %s220_s2 = inlined_call_operand.vmem [shape: f32[1,32], index: 2, kind: input, shape index: {}]   ;;  %s221_s3 = inlined_call_operand.hbm [shape: f32[16,32], index: 3, kind: output, shape index: {}]  }
   0x1   :  { %9 = vsyncpa [#allocation4], 0  ;;  %s170_s12 = smov [#allocation2]  }
   0x2   :  { %s15_s13 = sshll.u32 %s170_s12, 4  ;;  %s16_s13 = int_to_ptr.vmem [resolvable:$true] %s15_s13 }
   0x3   :  { %s134_s14 = scalar_lea.vmem %s16_s13, 256  ;;  %p139_p1 = scmp.lt.s32.totalorder %s16_s13, %s16_s13 }
   0x4   :  { %p135_p0 = scmp.ne.s32.totalorder %s16_s13, %s134_s14  ;;  %p140_p2 = scmp.lt.s32.totalorder %s134_s14, %s134_s14 }
   0x6   :  { %p141_p3 = por %p140_p2, %p139_p1 }
   0x8   :  { %p142_p4 = pnand %p141_p3, %p135_p0 }
   0xa   :  { %145 = shalt.err (!%p142_p4)
}
   0xb   :  { %s171_s15 = smov 128   ;;  %s172_s16 = smov 8  }
   0xc   :  { %21 = dma.hbm_to_vmem [thread:$0]  %s218_s0, 256, %s16_s13, [#allocation3], %s171_s15, %s171_s15, %s172_s16  }
   0xd   :  { %166 = dma.done.wait [#allocation3], 256  }
   0xe   :  { %167 = vsyncadd [#allocation3], 4294967040  ;;  %vm31_vm0 = vcmask 261120   ;;  %v29_v0 = vld [vmem:[#allocation2] sm:$0xff]  ;;  %v30_v1 = vld [vmem:[#allocation2 + $0x8] sm:$0xff]  ;;  %s173_s22 = smov [#allocation5]  }
   0xf   :  { %v32_v2 = vsel %vm31_vm0, %v29_v0, 0.0  ;;  %v35_v3 = vsel %vm31_vm0, %v30_v1, 0.0  ;;  %v112_v31 = vld [vmem:[%s219_s1] ss:$0 sm:$0xff]  ;;  %s100_s23 = sshll.u32 %s173_s22, 4  ;;  %s101_s23 = int_to_ptr.vmem [resolvable:$true] %s100_s23 }
  0x10   :  { %33 = vadd.xlane.f32.xlu0 %v32_v2  ;;  %v113_v33 = vld [vmem:[%s220_s2] ss:$0 sm:$0xff]  ;;  %s146_s24 = scalar_lea.vmem %s101_s23, 256  ;;  %p151_p6 = scmp.lt.s32.totalorder %s101_s23, %s101_s23 }
  0x11   :  { %p147_p5 = scmp.ne.s32.totalorder %s101_s23, %s146_s24  ;;  %p152_p7 = scmp.lt.s32.totalorder %s146_s24, %s146_s24 }
  0x13   :  { %p153_p8 = por %p152_p7, %p151_p6 }
  0x14   :  { %36 = vadd.xlane.f32.xlu0 %v35_v3 }
  0x15   :  { %p154_p9 = pnand %p153_p8, %p147_p5 }
  0x99   :  { %v34_v4 = vpop.xlane.xlu0 %33 }
  0x9a   :  { %v39_v5 = vmul.f32 0.03125, %v34_v4 }
  0x9c   :  { %v41_v6 = vsub.f32 %v29_v0, %v39_v5 }
  0x9d   :  { %v37_v7 = vpop.xlane.xlu0 %36 }
  0x9e   :  { %v40_v8 = vmul.f32 0.03125, %v37_v7  ;;  %v43_v9 = vmul.f32 %v41_v6, %v41_v6 }
  0xa0   :  { %v42_v10 = vsub.f32 %v30_v1, %v40_v8  ;;  %v45_v11 = vsel %vm31_vm0, %v43_v9, 0.0 }
  0xa1   :  { %46 = vadd.xlane.f32.xlu1 %v45_v11 }
  0xa2   :  { %v44_v12 = vmul.f32 %v42_v10, %v42_v10 }
  0xa4   :  { %v48_v13 = vsel %vm31_vm0, %v44_v12, 0.0 }
  0xa5   :  { %49 = vadd.xlane.f32.xlu1 %v48_v13 }
 0x12a   :  { %v47_v14 = vpop.xlane.xlu1 %46 }
 0x12b   :  { %v51_v15 = vmul.f32 0.032258064, %v47_v14 }
 0x12d   :  { %118 = vrsqrt.f32 %v51_v15  ;;  %vm55_vm1 = vcmp.eq.f32.partialorder %v51_v15, inf  ;;  %v58_v20 = vand.u32 2147483648, %v51_v15  ;;  %vm57_vm2 = vcmp.eq.f32.partialorder %v51_v15, 0.0 }
 0x12e   :  { %v50_v16 = vpop.xlane.xlu1 %49 }
 0x12f   :  { %v52_v17 = vmul.f32 0.032258064, %v50_v16 }
 0x131   :  { %120 = vrsqrt.f32 %v52_v17  ;;  %vm62_vm3 = vcmp.eq.f32.partialorder %v52_v17, inf  ;;  %v65_v26 = vand.u32 2147483648, %v52_v17  ;;  %vm64_vm4 = vcmp.eq.f32.partialorder %v52_v17, 0.0 }
 0x13a   :  { %v119_v18 = vpop.eup %118 }
 0x13b   :  { %v54_v19 = vmul.f32 %v119_v18, %v51_v15 }
 0x13d   :  { %v56_v21 = vsel %vm55_vm1, %v51_v15, %v54_v19 }
 0x13e   :  { %v121_v22 = vpop.eup %120  ;;  %v59_v23 = vsel %vm57_vm2, %v58_v20, %v56_v21 }
 0x13f   :  { %v67_v24 = vadd.f32 1e-06, %v59_v23  ;;  %v61_v25 = vmul.f32 %v121_v22, %v52_v17 }
 0x141   :  { %122 = vrcp.f32 %v67_v24  ;;  %v63_v27 = vsel %vm62_vm3, %v52_v17, %v61_v25 }
 0x142   :  { %v66_v28 = vsel %vm64_vm4, %v65_v26, %v63_v27 }
 0x143   :  { %v68_v29 = vadd.f32 1e-06, %v66_v28 }
 0x145   :  { %124 = vrcp.f32 %v68_v29 }
 0x14e   :  { %v123_v30 = vpop.eup %122 }
 0x14f   :  { %v75_v32 = vmul.f32 %v123_v30, %v41_v6 }
 0x151   :  { %v83_v34 = vmul.f32 %v112_v31, %v75_v32 }
 0x152   :  { %v125_v35 = vpop.eup %124 }
 0x153   :  { %v76_v36 = vmul.f32 %v125_v35, %v42_v10  ;;  %v91_v37 = vadd.f32 %v113_v33, %v83_v34 }
 0x155   :  { %v84_v38 = vmul.f32 %v112_v31, %v76_v36  ;;  %93 = vst.msk [vmem:[#allocation5] sm:$0xff] %vm31_vm0, %v91_v37 }
 0x157   :  { %v92_v39 = vadd.f32 %v113_v33, %v84_v38 }
 0x159   :  { %94 = vst.msk [vmem:[#allocation5 + $0x8] sm:$0xff] %vm31_vm0, %v92_v39 }
 0x15a   :  { %157 = shalt.err (!%p154_p9)
}
 0x15b   :  { %106 = dma.vmem_to_hbm [thread:$0]  %s101_s23, 256, %s221_s3, [#allocation4], %s171_s15, %s171_s15, %s172_s16  }
 0x15c   :  { %168 = dma.done.wait [#allocation4], 256  }
 0x15d   :  { %169 = vsyncadd [#allocation4], 4294967040 }
 0x15e   :  { %110 = vsyncpa [#allocation3], 1 }
 0x15f   :  { %111 = vsyncpa [#allocation4], 1 }

</bundles_post_ra>
